<compile_context>
chip_gen: v5e
topology: v5e:2x2
jax: 0.10.0
libtpu: 0.0.40
codegen_flags: <defaults>
</compile_context>

<pallas_src>
import jax
import jax.numpy as jnp
from jax.experimental import pallas as pl
from jax.experimental.pallas import tpu as pltpu

_LANES = 128
_TILE_BYTES_CAP = 4 * 1024 * 1024    # per-tile cap → 2in+2out bufs ≤ 16 MiB (v7x-safe)
_ONE_TILE_BYTES = 256 * 1024         # ≤ 256 KiB: a single tile is fine


def _identity_kernel(x_ref, o_ref):
    # Straight VMEM tile copy — the only "forward" compute that exists.
    o_ref[...] = x_ref[...]


def _choose_tile_rows(rows: int, itemsize: int) -> int:
    """Sublane-aligned, VMEM-budgeted tile height for the (rows, 128) slab."""
    sub = max(8, 32 // itemsize)                       # 8 f32 / 16 bf16 / 32 int8
    row_bytes = _LANES * itemsize
    cap_rows = max(sub, (_TILE_BYTES_CAP // row_bytes) // sub * sub)
    one_tile_rows = max(sub, _ONE_TILE_BYTES // row_bytes)
    if rows <= one_tile_rows:
        # Tiny input: one lane-dense tile covers everything (grid=(1,)).
        return pl.cdiv(rows, sub) * sub
    # Mid / large input: at least 2 (and an even number of) blocks so both
    # v7x TensorCores get work and read-of-next overlaps write-of-previous;
    # each block stays under the per-tile VMEM byte cap.
    num_blocks = max(2, pl.cdiv(rows, cap_rows))
    num_blocks += num_blocks % 2                       # force even block count
    tile_rows = pl.cdiv(pl.cdiv(rows, num_blocks), sub) * sub
    return max(sub, min(tile_rows, cap_rows))


@jax.jit
def _pallas_identity(x):
    """Lane-dense identity copy of an arbitrary-shaped array via Pallas."""
    orig_shape = x.shape
    total = x.size
    itemsize = jnp.dtype(x.dtype).itemsize

    if total % _LANES == 0:
        # Lane-dense factorization already exists: no pad, no trailing slice.
        rows = total // _LANES
        x2d = x.reshape(rows, _LANES)
        padded = False
    else:
        # TODO(synk): ragged tail could instead use an in-kernel masked
        # pltpu.store on the last block; pad fallback kept for simplicity
        # (and jit lets XLA fuse it with the surrounding reshapes).
        flat = x.reshape(-1)
        padded_total = pl.cdiv(total, _LANES) * _LANES
        flat = jnp.pad(flat, (0, padded_total - total))
        rows = padded_total // _LANES
        x2d = flat.reshape(rows, _LANES)
        padded = True

    tile_rows = _choose_tile_rows(rows, itemsize)
    grid = (pl.cdiv(rows, tile_rows),)   # Pallas masks any partial tail block

    out2d = pl.pallas_call(
        _identity_kernel,
        out_shape=jax.ShapeDtypeStruct((rows, _LANES), x2d.dtype),
        grid=grid,
        in_specs=[pl.BlockSpec((tile_rows, _LANES), lambda i: (i, 0))],
        out_specs=pl.BlockSpec((tile_rows, _LANES), lambda i: (i, 0)),
        # No input_output_aliases: under jit the un-padded reshape can alias
        # the caller's x, and donating it would invalidate the caller's buffer.
        compiler_params=pltpu.CompilerParams(
            dimension_semantics=("parallel",),
            vmem_limit_bytes=32 * 1024 * 1024,
        ),
    )(x2d)

    out_flat = out2d.reshape(-1)
    if padded:
        out_flat = out_flat[:total]
    return out_flat.reshape(orig_shape)


class TrajectoryNetwork:
    """JAX/Pallas port of the (empty) PyTorch TrajectoryNetwork."""

    def __init__(self):
        # Reference __init__ defines no parameters.
        pass

    def forward(self, x):
        # Reference forward is `pass` -> returns None.  We still run the
        # Pallas identity kernel over the input so the (trivial) hot path
        # executes on TPU; the kernel output is stashed for inspection.
        self.last_kernel_output = _pallas_identity(x)
        return None  # exact semantics of the PyTorch forward

    __call__ = forward


if __name__ == "__main__":
    key = jax.random.PRNGKey(0)
    x = jax.random.normal(key, (2, 4, 16, 16), dtype=jnp.float32)  # NCHW

    net = TrajectoryNetwork()
    out = net(x)

    # Forward semantics: returns None, exactly like the PyTorch module.
    assert out is None

    # Block on the kernel result and sanity-check the identity copy.
    kernel_out = jax.block_until_ready(net.last_kernel_output)
    assert kernel_out.shape == x.shape
    assert bool(jnp.allclose(kernel_out, x))

    print("KERNEL_OK")
</pallas_src>

<mosaic_0001>
module attributes {stable_mosaic.version = 11 : i64} {
  func.func @_identity_kernel(%arg0: i32, %arg1: memref<16x128xf32, #tpu.memory_space<vmem>>, %arg2: memref<16x128xf32, #tpu.memory_space<vmem>>) attributes {dimension_semantics = [#tpu.dimension_semantics<parallel>], iteration_bounds = array<i64: 1>, scalar_prefetch = 0 : i64, scratch_operands = 0 : i64, tpu.core_type = #tpu.core_type<tc>, window_params = [{transform_indices = @transform_0, window_bounds = array<i64: 16, 128>}, {transform_indices = @transform_1, window_bounds = array<i64: 16, 128>}]} {
    %c0 = arith.constant 0 : index
    %c0_0 = arith.constant 0 : index
    %0 = vector.load %arg1[%c0, %c0_0] : memref<16x128xf32, #tpu.memory_space<vmem>>, vector<16x128xf32>
    %c0_1 = arith.constant 0 : index
    %c0_2 = arith.constant 0 : index
    %1 = vector.load %arg2[%c0_1, %c0_2] : memref<16x128xf32, #tpu.memory_space<vmem>>, vector<16x128xf32>
    tpu.vector_store %arg2[%c0_1, %c0_2], %0 {strides = array<i32>} : memref<16x128xf32, #tpu.memory_space<vmem>>, vector<16x128xf32>,
    return
  }
  func.func @transform_0(%arg0: i32) -> (i32, i32) {
    %c0_i32 = arith.constant 0 : i32
    %c0_i32_0 = arith.constant 0 : i32
    return %arg0, %c0_i32 : i32, i32
  }
  func.func @transform_1(%arg0: i32) -> (i32, i32) {
    %c0_i32 = arith.constant 0 : i32
    %c0_i32_0 = arith.constant 0 : i32
    return %arg0, %c0_i32 : i32, i32
  }
}

</mosaic_0001>

<bundles_post_ra>
// kernel: _pallas_identity.1
= control target key start
LH: loop header
LB: loop body
LE: loop exit
PB: predicated region body
PF: predicated region fallthrough
CT: control target
= control target key end

     0   :  { %s38_s0 = inlined_call_operand.vmem [shape: f32[16,128], index: 0, kind: input, shape index: {}]   ;;  %s39_s1 = inlined_call_operand.vmem [shape: f32[16,128], index: 1, kind: output, shape index: {}]  }
   0x1   :  { %v8_v0 = vld [vmem:[%s38_s0] sm:$0xff]  ;;  %v9_v1 = vld [vmem:[%s38_s0 + $0x8] sm:$0xff] }
   0x2   :  { %10 = vst [vmem:[%s39_s1] sm:$0xff] %v8_v0 }
   0x3   :  { %11 = vst [vmem:[%s39_s1 + $0x8] sm:$0xff] %v9_v1 }

</bundles_post_ra>
